<compile_context>
chip_gen: v7x
topology: tpu7x:2x2x1
jax: 0.10.0
libtpu: 0.0.40
codegen_flags: <defaults>
</compile_context>

<pallas_src>
import functools
import math

import jax
import jax.numpy as jnp
from jax.experimental import pallas as pl
from jax.experimental.pallas import tpu as pltpu


def _round_up(x: int, m: int) -> int:
    return ((x + m - 1) // m) * m


def _chip_budget():
    """Per-generation scoped-VMEM cap (bytes) and one-hot/gather vocab crossover."""
    kind = ""
    try:
        kind = jax.devices()[0].device_kind.lower()
    except Exception:
        pass
    if "v7" in kind:
        # 64 MiB physical VMEM per TensorCore: leave headroom for compiler
        # scratch and Pallas double buffers instead of requesting all of it.
        return 48 << 20, 640
    if "v6" in kind:
        return 96 << 20, 1280      # 128 MiB physical; 918 TF/s vs ~1.4 TB/s
    if "v5" in kind:
        return 96 << 20, 512       # 128 MiB physical; 197 TF/s vs ~0.8 TB/s
    return 48 << 20, 768           # unknown part: conservative


def _table_block_spec(V, E):
    """Constant-index (whole-table) spec, single-buffered when supported."""
    idx = lambda i: (0, 0)
    try:
        return pl.BlockSpec((V, E), idx, pipeline_mode=pl.Buffered(1))
    except Exception:
        return pl.BlockSpec((V, E), idx)


# ---------------------------------------------------------------------------
# Path 1: small vocab — one-hot matmul on the MXU, table resident in VMEM.
# ---------------------------------------------------------------------------
def _onehot_embedding_kernel(tok_ref, table_ref, out_ref, *, vocab_size):
    # tok_ref:   (TN, 1)  int32
    # table_ref: (V, E)   bf16, pre-scaled by sqrt(E), constant block index
    # out_ref:   (TN, E)  out dtype
    toks = tok_ref[...]                                          # (TN, 1)
    tn = toks.shape[0]
    vocab_iota = jax.lax.broadcasted_iota(jnp.int32, (tn, vocab_size), 1)
    one_hot = (toks == vocab_iota).astype(table_ref.dtype)       # exact 0/1
    emb = jnp.dot(one_hot, table_ref[...],
                  preferred_element_type=jnp.float32)            # (TN, E) f32
    out_ref[...] = emb.astype(out_ref.dtype)                     # cast only
    # TODO(synk): if this path is ever extended to V >> a few thousand, chunk
    # the contraction over V so the (TN, V) iota/one-hot temporaries stay small.


def _token_embedding_onehot(tok_flat, table, *, scale, tile_n, out_dtype, vmem_cap):
    n_pad = tok_flat.shape[0]
    V, E = table.shape
    out_item = jnp.dtype(out_dtype).itemsize
    # Fold sqrt(E) into the one-time bf16 cast (scale applied before quantize).
    table_prep = (table.astype(jnp.float32) * scale).astype(jnp.bfloat16)

    est = (V * E * 2                        # bf16 table (single-buffered)
           + 2 * tile_n * E * out_item      # output double-buffer
           + 2 * tile_n * 128 * 4           # token-id block (lane padded) x2
           + tile_n * V * 6                 # iota (i32) + one-hot (bf16) temps
           + tile_n * E * 4)                # f32 matmul result
    vmem_limit = int(min(max(est + (8 << 20), 32 << 20), vmem_cap))

    kernel = functools.partial(_onehot_embedding_kernel, vocab_size=V)
    return pl.pallas_call(
        kernel,
        out_shape=jax.ShapeDtypeStruct((n_pad, E), out_dtype),
        grid_spec=pltpu.PrefetchScalarGridSpec(
            num_scalar_prefetch=0,
            grid=(n_pad // tile_n,),
            in_specs=[
                pl.BlockSpec((tile_n, 1), lambda i: (i, 0)),   # token-id tile
                _table_block_spec(V, E),                       # resident table
            ],
            out_specs=pl.BlockSpec((tile_n, E), lambda i: (i, 0)),
        ),
        compiler_params=pltpu.CompilerParams(
            dimension_semantics=("parallel",),
            vmem_limit_bytes=vmem_limit),
    )(tok_flat.reshape(n_pad, 1), table_prep)


# ---------------------------------------------------------------------------
# Path 2: large vocab — row gather straight from HBM, double-buffered DMAs.
# ---------------------------------------------------------------------------
def _gather_embedding_kernel(tok_smem, table_hbm, out_ref, row_buf, sem,
                             *, tile_n, scale):
    # tok_smem:  (N_pad,)         int32, SMEM (scalar prefetch)
    # table_hbm: (V, E)           table dtype, HBM (memory_space=pl.ANY)
    # out_ref:   (tile_n, E)      out dtype, VMEM
    # row_buf:   (2, tile_n, E)   table dtype, VMEM double buffer
    # sem:       (2,)             DMA semaphores, one per slot
    step = pl.program_id(0)
    nsteps = pl.num_programs(0)
    slot = jax.lax.rem(step, 2)

    def issue_tile(t, s):
        base = t * tile_n
        @pl.loop(0, tile_n)
        def _issue(j):
            tid = tok_smem[base + j]
            pltpu.make_async_copy(
                table_hbm.at[pl.ds(tid, 1), :],
                row_buf.at[s, pl.ds(j, 1), :],
                sem.at[s]).start()

    # Prime the pipeline: gather the first tile into slot 0.
    @pl.when(step == 0)
    def _prime():
        issue_tile(0, 0)

    # Prefetch the NEXT tile's rows into the other slot; its HBM round trip
    # overlaps this step's drain + epilogue + Pallas output write-back.
    @pl.when(step + 1 < nsteps)
    def _prefetch():
        issue_tile(step + 1, 1 - slot)

    # Single drain: DMA semaphores count bytes, so one wait whose descriptor
    # covers the whole (tile_n, E) slot matches the tile_n row copies that
    # signalled sem[slot] (replaces tile_n per-row waits).
    pltpu.make_async_copy(row_buf.at[1 - slot], row_buf.at[slot],
                          sem.at[slot]).wait()

    # Fuse sqrt(E) into the one unavoidable copy into the output block.
    out_ref[...] = (row_buf[slot] * scale).astype(out_ref.dtype)


def _token_embedding_gather(tok_flat, table, *, scale, tile_n, out_dtype, vmem_cap):
    n_pad = tok_flat.shape[0]
    V, E = table.shape
    tbl_item = jnp.dtype(table.dtype).itemsize
    out_item = jnp.dtype(out_dtype).itemsize

    est = 2 * tile_n * E * tbl_item + 2 * tile_n * E * out_item
    vmem_limit = int(min(max(est + (8 << 20), 32 << 20), vmem_cap))

    kernel = functools.partial(_gather_embedding_kernel, tile_n=tile_n, scale=scale)
    return pl.pallas_call(
        kernel,
        out_shape=jax.ShapeDtypeStruct((n_pad, E), out_dtype),
        grid_spec=pltpu.PrefetchScalarGridSpec(
            num_scalar_prefetch=1,                         # token ids -> SMEM
            grid=(n_pad // tile_n,),
            in_specs=[pl.BlockSpec(memory_space=pl.ANY)],  # table stays in HBM
            out_specs=pl.BlockSpec((tile_n, E), lambda i, tok: (i, 0)),
            scratch_shapes=[
                pltpu.VMEM((2, tile_n, E), table.dtype),   # double-buffered rows
                pltpu.SemaphoreType.DMA((2,)),             # one sem per slot
            ],
        ),
        compiler_params=pltpu.CompilerParams(
            # "arbitrary": the kernel carries prefetched rows across grid steps
            # in its scratch double buffer, which must not be split across TCs.
            # TODO(synk): explicit leading core axis on v7x so both TensorCores
            # issue gather DMAs against the shared 3.2 TB/s HBM.
            dimension_semantics=("arbitrary",),
            vmem_limit_bytes=vmem_limit),
    )(tok_flat, table)


# ---------------------------------------------------------------------------
# Wrapper
# ---------------------------------------------------------------------------
def token_embedding(tokens, table, *, tile_n=None, out_dtype=jnp.float32,
                    force_gather=False):
    """tokens: (B, S) int; table: (V, E) -> (B, S, E) out_dtype.

    out_dtype=jnp.bfloat16 halves the HBM write-back bytes (both paths are
    write-back bound) when the consumer accepts bf16 activations.
    """
    B, S = tokens.shape
    V, E = table.shape
    N = B * S
    scale = float(math.sqrt(E))
    vmem_cap, v_cutoff = _chip_budget()
    tbl_item = jnp.dtype(table.dtype).itemsize
    out_item = jnp.dtype(out_dtype).itemsize

    # Path choice: the one-hot matmul does V redundant MACs per row, so it
    # only stays effectively free while V is below the per-generation MXU/HBM
    # crossover; rows below ~2 KiB make the gather descriptor-issue bound, so
    # allow a larger vocab on the MXU path in that regime (as long as the bf16
    # table still fits comfortably in the VMEM budget).
    small_rows = E * tbl_item < 2048
    v_limit = v_cutoff * (4 if small_rows else 1)
    table_fits = V * E * 2 <= vmem_cap // 3
    use_gather = force_gather or (V > v_limit) or (not table_fits)

    # Tile over the flattened token axis: sublane-friendly (multiple of 16),
    # capped so the per-step working set fits the per-generation VMEM budget,
    # and never larger than the padded token count (decode-sized calls get
    # small tiles instead of 128+-row padding).
    if use_gather:
        per_row = E * (2 * tbl_item + 2 * out_item)
        fixed = 0
    else:
        per_row = 2 * E * out_item + 2 * 128 * 4 + V * 6 + E * 4
        fixed = V * E * 2
    budget = int(vmem_cap * 0.7) - fixed
    cap = max(16, (budget // max(per_row, 1)) // 16 * 16)
    want = 512 if tile_n is None else int(tile_n)
    tile = min(want, cap, _round_up(N, 16), 1024)
    tile = max(16, (tile // 16) * 16)

    n_pad = _round_up(N, tile)
    # Clamp ids once: (a) padded rows / out-of-range ids can never drive an
    # out-of-bounds HBM row DMA, (b) both paths agree.  (PyTorch would raise.)
    tok_flat = jnp.clip(tokens.reshape(N).astype(jnp.int32), 0, V - 1)
    if n_pad != N:
        tok_flat = jnp.pad(tok_flat, (0, n_pad - N))
    # TODO(synk): for very large N (> ~256K tokens) chunk the call so the
    # scalar-prefetched id vector stays within SMEM capacity.

    if use_gather:
        out_flat = _token_embedding_gather(
            tok_flat, table, scale=scale, tile_n=tile, out_dtype=out_dtype,
            vmem_cap=vmem_cap)
    else:
        out_flat = _token_embedding_onehot(
            tok_flat, table, scale=scale, tile_n=tile, out_dtype=out_dtype,
            vmem_cap=vmem_cap)

    return out_flat[:N].reshape(B, S, E)


if __name__ == "__main__":
    # Shapes implied by the module: (batch, seq) integer tokens, small vocab.
    B, S = 2, 8
    VOCAB, EMB = 32, 128

    key = jax.random.PRNGKey(0)
    k_tok, k_emb, k_tok2, k_emb2 = jax.random.split(key, 4)
    tokens = jax.random.randint(k_tok, (B, S), 0, VOCAB, dtype=jnp.int32)
    emb_table = jax.random.normal(k_emb, (VOCAB, EMB), dtype=jnp.float32)
    scale = math.sqrt(EMB)

    # 1) Small-vocab MXU one-hot path (sqrt(E) folded into the bf16 table cast).
    out = jax.block_until_ready(token_embedding(tokens, emb_table))
    ref_bf16 = (emb_table * scale).astype(jnp.bfloat16).astype(jnp.float32)[tokens]
    assert out.shape == (B, S, EMB) and out.dtype == jnp.float32
    assert jnp.allclose(out, ref_bf16, atol=1e-3, rtol=1e-3), "onehot path mismatch"

    # 2) Forced HBM row-gather on the same shape (single-step, exact f32).
    out_g = jax.block_until_ready(
        token_embedding(tokens, emb_table, force_gather=True))
    ref_f32 = emb_table[tokens] * scale
    assert jnp.allclose(out_g, ref_f32, atol=1e-5, rtol=1e-5), "gather path mismatch"

    # 3) Multi-step gather exercising the cross-step DMA double buffer.
    V2, E2, B2, S2 = 2048, 256, 4, 128                    # N=512, 4 grid steps
    tokens2 = jax.random.randint(k_tok2, (B2, S2), 0, V2, dtype=jnp.int32)
    table2 = jax.random.normal(k_emb2, (V2, E2), dtype=jnp.float32)
    out2 = jax.block_until_ready(
        token_embedding(tokens2, table2, tile_n=128, force_gather=True))
    ref2 = table2[tokens2] * math.sqrt(E2)
    assert out2.shape == (B2, S2, E2)
    assert jnp.allclose(out2, ref2, atol=1e-5, rtol=1e-5), "multi-step gather mismatch"

    # 4) bf16 output on the gather path (halves HBM write-back bytes).
    out_bf = jax.block_until_ready(
        token_embedding(tokens2, table2, tile_n=128, force_gather=True,
                        out_dtype=jnp.bfloat16))
    assert out_bf.dtype == jnp.bfloat16
    assert jnp.allclose(out_bf.astype(jnp.float32), ref2, atol=1e-2, rtol=2e-2), \
        "bf16-output gather mismatch"

    print("KERNEL_OK")
</pallas_src>

<mosaic_0001>
module attributes {stable_mosaic.version = 11 : i64} {
  func.func @_onehot_embedding_kernel(%arg0: i32, %arg1: memref<16x1xi32, #tpu.memory_space<vmem>>, %arg2: memref<32x128xbf16, #tpu.memory_space<vmem>>, %arg3: memref<16x128xf32, #tpu.memory_space<vmem>>) attributes {dimension_semantics = [#tpu.dimension_semantics<parallel>], iteration_bounds = array<i64: 1>, scalar_prefetch = 0 : i64, scratch_operands = 0 : i64, tpu.core_type = #tpu.core_type<tc>, window_params = [{transform_indices = @transform_0, window_bounds = array<i64: 16, 1>}, {pipeline_mode = #tpu.pipeline_mode<synchronous>, transform_indices = @transform_1, window_bounds = array<i64: 32, 128>}, {transform_indices = @transform_2, window_bounds = array<i64: 16, 128>}]} {
    %c0 = arith.constant 0 : index
    %c0_0 = arith.constant 0 : index
    %0 = vector.load %arg1[%c0, %c0_0] : memref<16x1xi32, #tpu.memory_space<vmem>>, vector<16x1xi32>
    %1 = tpu.iota {dimensions = array<i32: 1>} : vector<16x32xi32>
    %2 = vector.broadcast %0 : vector<16x1xi32> to vector<16x32xi32>
    %3 = arith.cmpi eq, %2, %1 : vector<16x32xi32>
    %4 = arith.extui %3 : vector<16x32xi1> to vector<16x32xi32>
    %5 = arith.sitofp %4 : vector<16x32xi32> to vector<16x32xf32>
    %6 = arith.truncf %5 : vector<16x32xf32> to vector<16x32xbf16>
    %c0_1 = arith.constant 0 : index
    %c0_2 = arith.constant 0 : index
    %7 = vector.load %arg2[%c0_1, %c0_2] : memref<32x128xbf16, #tpu.memory_space<vmem>>, vector<32x128xbf16>
    %cst = arith.constant dense<0.000000e+00> : vector<16x128xf32>
    %8 = tpu.matmul %6, %7, %cst {dimension_numbers = #tpu.dot_dimension_numbers<[1], [0], [0], [1], [0, 0, 1, 1], [], []>} : vector<16x32xbf16>, vector<32x128xbf16>, vector<16x128xf32> -> vector<16x128xf32>
    %c0_3 = arith.constant 0 : index
    %c0_4 = arith.constant 0 : index
    %9 = vector.load %arg3[%c0_3, %c0_4] : memref<16x128xf32, #tpu.memory_space<vmem>>, vector<16x128xf32>
    tpu.vector_store %arg3[%c0_3, %c0_4], %8 {strides = array<i32>} : memref<16x128xf32, #tpu.memory_space<vmem>>, vector<16x128xf32>,
    return
  }
  func.func @transform_0(%arg0: i32) -> (i32, i32) {
    %c0_i32 = arith.constant 0 : i32
    %c0_i32_0 = arith.constant 0 : i32
    return %arg0, %c0_i32 : i32, i32
  }
  func.func @transform_1(%arg0: i32) -> (i32, i32) {
    %c0_i32 = arith.constant 0 : i32
    %c0_i32_0 = arith.constant 0 : i32
    %c0_i32_1 = arith.constant 0 : i32
    return %c0_i32, %c0_i32_0 : i32, i32
  }
  func.func @transform_2(%arg0: i32) -> (i32, i32) {
    %c0_i32 = arith.constant 0 : i32
    %c0_i32_0 = arith.constant 0 : i32
    return %arg0, %c0_i32 : i32, i32
  }
}

</mosaic_0001>

<bundles_post_ra>
// kernel: tpu_custom_call.1
= control target key start
LH: loop header
LB: loop body
LE: loop exit
PB: predicated region body
PF: predicated region fallthrough
CT: control target
= control target key end

     0   :  { %v158_v1 = vmov 0   ;;  %v159_v2 = vmov 0.0   ;;  %s203_s0 = inlined_call_operand.vmem [shape: s32[16,1], index: 0, kind: input, shape index: {}]   ;;  %s204_s1 = inlined_call_operand.vmem [shape: bf16[32,128], index: 1, kind: input, shape index: {}]   ;;  %s205_s2 = inlined_call_operand.hbm [shape: f32[16,128], index: 2, kind: output, shape index: {}]  }
   0x1   :  { %v13_v0 = vld [vmem:[%s203_s0] sm:$0xff]  ;;  %131 = vset.pattern.permute.xlu0 %v158_v1  ;;  %117 = vmatprep.subr.bf16.mxu0 %v159_v2 }
   0x2   :  { %v132_v3 = vld [vmem:[%s204_s1] sm:$0xff]   ;;  %18 = vperm.xlu0 %131, %v13_v0  }
   0x3   :  { %7 = vsyncpa [#allocation3], 0  ;;  %v14_v4 = vld [vmem:[%s203_s0 + $0x8] sm:$0xff]  ;;  %118 = vmatpush3.bf16.msra.mxu0 %v132_v3  ;;  %vm160_vm0 = vmmov 0   ;;  %v15_v6 = vlaneseq  ;;  %vm46_vm3 = vcmask 261120   ;;  %s161_s0 = smov [#allocation2]  }
   0x4   :  { %119 = vmatprep.subr.bf16.mxu0 %v159_v2  ;;  %v133_v5 = vld [vmem:[%s204_s1 + $0x8] sm:$0xff]   ;;  %121 = vmatprep.mubr.msk.bf16.mxu0 %vm160_vm0, %v159_v2  ;;  %s98_s17 = sshll.u32 %s161_s0, 4  ;;  %s99_s17 = int_to_ptr.vmem [resolvable:$true] %s98_s17 }
   0x5   :  { %v16_v7 = vand.u32 127, %v15_v6  ;;  %s134_s1 = scalar_lea.vmem %s99_s17, 256  ;;  %p139_p1 = scmp.lt.s32.totalorder %s99_s17, %s99_s17 }
   0x6   :  { %21 = vperm.xlu0 %131, %v14_v4   ;;  %p135_p0 = scmp.ne.s32.totalorder %s99_s17, %s134_s1  ;;  %p140_p2 = scmp.lt.s32.totalorder %s134_s1, %s134_s1 }
   0x7   :  { %120 = vmatpush3.bf16.msra.mxu0 %v133_v5 }
   0x8   :  { %p141_p3 = por %p140_p2, %p139_p1 }
   0xa   :  { %p142_p4 = pnand %p141_p3, %p135_p0 }
  0x81   :  { %v19_v8 = vpop.permute.xlu0 %18 }
  0x82   :  { %vm23_vm1 = vcmp.eq.s32.totalorder %v19_v8, %v16_v7 }
  0x83   :  { %v109_v10 = vsel %vm23_vm1, 1.0, %v159_v2 }
  0x85   :  { %v22_v9 = vpop.permute.xlu0 %21 }
  0x86   :  { %vm24_vm2 = vcmp.eq.s32.totalorder %v22_v9, %v16_v7 }
  0x87   :  { %v110_v11 = vsel %vm24_vm2, 1.0, %v159_v2 }
  0x88   :  { %v29_v12 = vpack.c.bf16 %v110_v11, %v109_v10 }
  0x8a   :  { %122 = vmatmul.mubr.msk.bf16.vlgmr.msra.gmra.mrb[0].mxu0 %vm46_vm3, %v29_v12 }
 0x15d   :  { %v84_v13 = vpop.f32.mrb[0].mxu0 }
 0x15e   :  { %91 = vst [vmem:[#allocation2] sm:$0xff] %v84_v13  ;;  %v123_v14 = vpop.f32.mrb[1].mxu0 }
 0x15f   :  { %v87_v15 = vpop.f32.mrb[2].mxu0 }
 0x160   :  { %92 = vst [vmem:[#allocation2 + $0x8] sm:$0xff] %v87_v15  ;;  %v124_v16 = vpop.f32.mrb[3].mxu0 }
 0x161   :  { %145 = shalt.err (!%p142_p4)
}
 0x162   :  { %s146_s20 = scalar_lea.hbm %s205_s2, 256 }
 0x163   :  { %p147_p5 = scmp.ne.s32.totalorder %s205_s2, %s146_s20  ;;  %p150_p6 = scmp.lt.u32.totalorder %s146_s20, %s205_s2 }
 0x165   :  { %p152_p7 = pnand %p150_p6, %p147_p5 }
 0x167   :  { %155 = shalt.err (!%p152_p7)
}
 0x168   :  { %s162_s25 = smov 128   ;;  %s163_s26 = smov 8  }
 0x169   :  { %104 = dma.vmem_to_hbm [thread:$0]  %s99_s17, 256, %s205_s2, [#allocation3], %s162_s25, %s162_s25, %s163_s26  }
 0x16a   :  { %156 = dma.done.wait [#allocation3], 256  }
 0x16b   :  { %157 = vsyncadd [#allocation3], 4294967040 }
 0x16c   :  { %108 = vsyncpa [#allocation3], 1 }

</bundles_post_ra>
